<compile_context>
chip_gen: v7x
topology: tpu7x:2x2x1
jax: 0.10.0
libtpu: 0.0.40
codegen_flags: <defaults>
</compile_context>

<pallas_src>
import functools

import jax
import jax.numpy as jnp
from jax.experimental import pallas as pl
from jax.experimental.pallas import tpu as pltpu


# --------------------------------------------------------------------------- #
# Helpers
# --------------------------------------------------------------------------- #
def _round_up(x, m):
    return ((x + m - 1) // m) * m


def _vmem_capacity_bytes():
    try:
        return int(pltpu.get_tpu_info().vmem_capacity_bytes)
    except Exception:
        return 64 * 1024 * 1024   # conservative: v7x per-TensorCore VMEM


def _default_per_buffer_budget():
    # Working set per grid step ~= 2 (double buffer) x 2 (in + out) x block.
    # Keep that at <= ~cap/3: ~10-12 MiB blocks on v5e/v6e (128 MiB VMEM),
    # ~5 MiB on v7x (64 MiB/TC).
    cap = _vmem_capacity_bytes()
    return max(1 << 20, min(12 << 20, cap // 12))


# --------------------------------------------------------------------------- #
# Fused single-pass kernel (one or more full samples per grid step)
# --------------------------------------------------------------------------- #
def _ca_fused_kernel(x_ref, w1_ref, b1_ref, w2_ref, b2_ref, o_ref, *, inv_hw):
    # x_ref : (Bn, C, HWp) in the I/O dtype
    # w1_ref: (Cr, C) f32, b1_ref: (1, Cr) f32
    # w2_ref: (C, Cr) f32, b2_ref: (1, C) f32

    # Global average pool: reduce over the lane axis in f32. The cast fuses into
    # the reduction; no full-slab f32 temporary is kept live across the body.
    y = jnp.sum(x_ref[...].astype(jnp.float32), axis=-1) * inv_hw      # (Bn, C)

    # 1x1 conv #1 (C -> Cr) + ReLU.  Tiny contraction: VPU/XLU path, not MXU.
    w1 = w1_ref[...]                                                   # (Cr, C)
    z1 = jnp.sum(y[:, None, :] * w1[None, :, :], axis=-1)              # (Bn, Cr)
    z1 = jnp.maximum(z1 + b1_ref[...], 0.0)

    # 1x1 conv #2 (Cr -> C) + sigmoid.
    w2 = w2_ref[...]                                                   # (C, Cr)
    z2 = jnp.sum(z1[:, None, :] * w2[None, :, :], axis=-1)             # (Bn, C)
    attn = jax.nn.sigmoid(z2 + b2_ref[...])                            # (Bn, C)

    # Re-read the slab and scale it in the I/O dtype (bf16 VALU exists on
    # v6e/v7x; Mosaic upcasts internally on v5e). No upcast copy is held.
    o_ref[...] = x_ref[...] * attn.astype(o_ref.dtype)[:, :, None]


# --------------------------------------------------------------------------- #
# Two-pass fallback kernels for large feature maps (HW-tiled)
# --------------------------------------------------------------------------- #
def _pool_sum_kernel(x_ref, sum_ref):
    # x_ref: (N, C, THW); sum_ref: (N, C) f32, resident across the HW grid axis.
    @pl.when(pl.program_id(0) == 0)
    def _():
        sum_ref[...] = jnp.zeros_like(sum_ref)
    sum_ref[...] += jnp.sum(x_ref[...].astype(jnp.float32), axis=-1)


def _scale_kernel(attn_ref, x_ref, o_ref):
    # attn_ref: (N, C) f32; x_ref/o_ref: (N, C, THW) in the I/O dtype.
    o_ref[...] = x_ref[...] * attn_ref[...].astype(o_ref.dtype)[:, :, None]


# --------------------------------------------------------------------------- #
# Wrapper
# --------------------------------------------------------------------------- #
def ca_layer(x, w1, b1, w2, b2, *, per_buffer_budget=None):
    """x: (N, C, H, W), f32 or bf16. Returns (N, C, H, W) in x.dtype."""
    N, C, H, W = x.shape
    Cr = w1.shape[0]
    HW = H * W
    itemsize = jnp.dtype(x.dtype).itemsize
    if per_buffer_budget is None:
        per_buffer_budget = _default_per_buffer_budget()

    w1f = w1.reshape(Cr, C).astype(jnp.float32)
    w2f = w2.reshape(C, Cr).astype(jnp.float32)
    b1f = b1.reshape(1, Cr).astype(jnp.float32)
    b2f = b2.reshape(1, C).astype(jnp.float32)
    weight_bytes = 4 * (Cr * C + C * Cr + Cr + C)

    sample_bytes = C * _round_up(HW, 128) * itemsize

    if sample_bytes <= per_buffer_budget:
        # ------------------------ fused single-pass path ---------------------
        HWp = _round_up(HW, 128)                 # lane-dense, unmasked stores
        Bn = max(1, min(N, per_buffer_budget // sample_bytes))
        if N >= 2:
            Bn = min(Bn, -(-N // 2))             # >=2 grid steps: both v7x TCs stream
        while N % Bn != 0:                       # avoid a ragged tail block
            Bn -= 1
        grid = (N // Bn,)

        x_flat = x.reshape(N, C, HW)
        if HWp != HW:
            x_flat = jnp.pad(x_flat, ((0, 0), (0, 0), (0, HWp - HW)))

        block_bytes = Bn * C * HWp * itemsize
        # 2 (double-buffer) x (in + out) blocks + weights + slack.
        vmem_limit = int(max(32 << 20, 4 * block_bytes + 4 * weight_bytes + (4 << 20)))

        io_bytes = 2 * N * C * HWp * itemsize + weight_bytes
        flops = 3 * N * C * HW + 4 * N * C * Cr + 2 * N * (C + Cr)
        cost = pl.CostEstimate(flops=flops, transcendentals=N * C,
                               bytes_accessed=io_bytes)

        out = pl.pallas_call(
            functools.partial(_ca_fused_kernel, inv_hw=1.0 / HW),
            out_shape=jax.ShapeDtypeStruct((N, C, HWp), x.dtype),
            grid_spec=pltpu.PrefetchScalarGridSpec(
                num_scalar_prefetch=0,
                grid=grid,
                in_specs=[
                    pl.BlockSpec((Bn, C, HWp), lambda n: (n, 0, 0)),
                    pl.BlockSpec((Cr, C), lambda n: (0, 0)),
                    pl.BlockSpec((1, Cr), lambda n: (0, 0)),
                    pl.BlockSpec((C, Cr), lambda n: (0, 0)),
                    pl.BlockSpec((1, C), lambda n: (0, 0)),
                ],
                out_specs=pl.BlockSpec((Bn, C, HWp), lambda n: (n, 0, 0)),
            ),
            compiler_params=pltpu.CompilerParams(
                dimension_semantics=("parallel",),
                vmem_limit_bytes=vmem_limit,
            ),
            cost_estimate=cost,
        )(x_flat, w1f, b1f, w2f, b2f)

        if HWp != HW:
            out = out[..., :HW]
        return out.reshape(N, C, H, W)

    # -------------------- two-pass fallback (large H*W) ----------------------
    # One (C, HW) sample no longer fits the per-buffer budget: tile the spatial
    # axis instead. Pass 1 accumulates per-(sample, channel) sums over HW tiles;
    # the tiny C->Cr->C FC is left to XLA (a few KB of math); pass 2 re-streams
    # the slab and applies the per-channel scale.
    # TODO(synk): also tile the batch axis here if N*C ever gets large enough
    # that a single 128-lane tile exceeds the budget.
    thw = (per_buffer_budget // max(N * C * itemsize, 1)) // 128 * 128
    thw = max(128, thw)
    HWp = _round_up(HW, thw)                     # zero-pad -> exact tiling, no OOB
    grid_hw = HWp // thw

    x_flat = x.reshape(N, C, HW)
    if HWp != HW:
        x_flat = jnp.pad(x_flat, ((0, 0), (0, 0), (0, HWp - HW)))

    block_bytes = N * C * thw * itemsize
    vmem_limit = int(max(32 << 20, 4 * block_bytes + (4 << 20)))

    sums = pl.pallas_call(
        _pool_sum_kernel,
        out_shape=jax.ShapeDtypeStruct((N, C), jnp.float32),
        grid_spec=pltpu.PrefetchScalarGridSpec(
            num_scalar_prefetch=0,
            grid=(grid_hw,),
            in_specs=[pl.BlockSpec((N, C, thw), lambda h: (0, 0, h))],
            out_specs=pl.BlockSpec((N, C), lambda h: (0, 0)),
        ),
        compiler_params=pltpu.CompilerParams(
            dimension_semantics=("arbitrary",),   # carried accumulator over HW
            vmem_limit_bytes=vmem_limit,
        ),
        cost_estimate=pl.CostEstimate(
            flops=N * C * HWp, transcendentals=0,
            bytes_accessed=N * C * HWp * itemsize + N * C * 4),
    )(x_flat)

    y = sums * (1.0 / HW)
    z1 = jnp.maximum(y @ w1f.T + b1f, 0.0)
    attn = jax.nn.sigmoid(z1 @ w2f.T + b2f).astype(jnp.float32)   # (N, C)

    out = pl.pallas_call(
        _scale_kernel,
        out_shape=jax.ShapeDtypeStruct((N, C, HWp), x.dtype),
        grid_spec=pltpu.PrefetchScalarGridSpec(
            num_scalar_prefetch=0,
            grid=(grid_hw,),
            in_specs=[
                pl.BlockSpec((N, C), lambda h: (0, 0)),
                pl.BlockSpec((N, C, thw), lambda h: (0, 0, h)),
            ],
            out_specs=pl.BlockSpec((N, C, thw), lambda h: (0, 0, h)),
        ),
        compiler_params=pltpu.CompilerParams(
            dimension_semantics=("parallel",),
            vmem_limit_bytes=vmem_limit,
        ),
        cost_estimate=pl.CostEstimate(
            flops=N * C * HWp, transcendentals=0,
            bytes_accessed=2 * N * C * HWp * itemsize + N * C * 4),
    )(attn, x_flat)

    if HWp != HW:
        out = out[..., :HW]
    return out.reshape(N, C, H, W)


def ca_layer_ref(x, w1, b1, w2, b2):
    """Pure-JAX reference matching the PyTorch forward (math in f32)."""
    xf = x.astype(jnp.float32)
    y = jnp.mean(xf, axis=(2, 3))                       # (N, C)
    z1 = jnp.maximum(y @ w1.T + b1, 0.0)                # (N, Cr)
    z2 = jax.nn.sigmoid(z1 @ w2.T + b2)                 # (N, C)
    return xf * z2[:, :, None, None]                    # f32


if __name__ == "__main__":
    # Module config: channel=32, reduction=16 -> hidden channels Cr = 2
    N, C, H, W = 2, 32, 16, 16
    reduction = 16
    Cr = C // reduction

    key = jax.random.PRNGKey(0)
    kx, k1, k2, k3, k4 = jax.random.split(key, 5)

    x = jax.random.normal(kx, (N, C, H, W), dtype=jnp.float32)
    # Conv2d 1x1 weights squeezed to 2D: (out, in, 1, 1) -> (out, in).
    w1 = 0.1 * jax.random.normal(k1, (Cr, C), dtype=jnp.float32)
    b1 = 0.1 * jax.random.normal(k2, (Cr,), dtype=jnp.float32)
    w2 = 0.1 * jax.random.normal(k3, (C, Cr), dtype=jnp.float32)
    b2 = 0.1 * jax.random.normal(k4, (C,), dtype=jnp.float32)

    ref = ca_layer_ref(x, w1, b1, w2, b2)

    # 1) Fused single-pass path (f32 I/O).
    out = jax.block_until_ready(ca_layer(x, w1, b1, w2, b2))
    assert out.shape == (N, C, H, W)
    assert jnp.allclose(out, ref, atol=1e-5, rtol=1e-5), "f32 fused path mismatch"

    # 2) bf16 I/O (halves HBM bytes; attention math stays f32 inside the kernel).
    out_bf16 = jax.block_until_ready(
        ca_layer(x.astype(jnp.bfloat16), w1, b1, w2, b2))
    assert out_bf16.dtype == jnp.bfloat16
    assert jnp.allclose(out_bf16.astype(jnp.float32), ref, atol=5e-2, rtol=5e-2), \
        "bf16 fused path mismatch"

    # 3) Force the large-feature-map two-pass fallback with a tiny budget.
    out_fb = jax.block_until_ready(
        ca_layer(x, w1, b1, w2, b2, per_buffer_budget=8 * 1024))
    assert jnp.allclose(out_fb, ref, atol=1e-5, rtol=1e-5), "two-pass fallback mismatch"

    print("KERNEL_OK")
</pallas_src>

<mosaic_0001>
module attributes {stable_mosaic.version = 11 : i64} {
  func.func @_ca_fused_kernel(%arg0: i32, %arg1: memref<1x32x256xf32, #tpu.memory_space<vmem>>, %arg2: memref<2x32xf32, #tpu.memory_space<vmem>>, %arg3: memref<1x2xf32, #tpu.memory_space<vmem>>, %arg4: memref<32x2xf32, #tpu.memory_space<vmem>>, %arg5: memref<1x32xf32, #tpu.memory_space<vmem>>, %arg6: memref<1x32x256xf32, #tpu.memory_space<vmem>>) attributes {dimension_semantics = [#tpu.dimension_semantics<parallel>], iteration_bounds = array<i64: 2>, scalar_prefetch = 0 : i64, scratch_operands = 0 : i64, tpu.core_type = #tpu.core_type<tc>, window_params = [{transform_indices = @transform_0, window_bounds = array<i64: 1, 32, 256>}, {pipeline_mode = #tpu.pipeline_mode<synchronous>, transform_indices = @transform_1, window_bounds = array<i64: 2, 32>}, {pipeline_mode = #tpu.pipeline_mode<synchronous>, transform_indices = @transform_2, window_bounds = array<i64: 1, 2>}, {pipeline_mode = #tpu.pipeline_mode<synchronous>, transform_indices = @transform_3, window_bounds = array<i64: 32, 2>}, {pipeline_mode = #tpu.pipeline_mode<synchronous>, transform_indices = @transform_4, window_bounds = array<i64: 1, 32>}, {transform_indices = @transform_5, window_bounds = array<i64: 1, 32, 256>}]} {
    %c0 = arith.constant 0 : index
    %c0_0 = arith.constant 0 : index
    %c0_1 = arith.constant 0 : index
    %0 = vector.load %arg1[%c0, %c0_0, %c0_1] : memref<1x32x256xf32, #tpu.memory_space<vmem>>, vector<1x32x256xf32>
    %cst = arith.constant dense<0.000000e+00> : vector<1x32xf32>
    %1 = vector.multi_reduction <add>, %0, %cst [2] : vector<1x32x256xf32> to vector<1x32xf32>
    %cst_2 = arith.constant 3.906250e-03 : f32
    %2 = vector.broadcast %cst_2 : f32 to vector<1x32xf32>
    %3 = arith.mulf %1, %2 : vector<1x32xf32>
    %c0_3 = arith.constant 0 : index
    %c0_4 = arith.constant 0 : index
    %4 = vector.load %arg2[%c0_3, %c0_4] : memref<2x32xf32, #tpu.memory_space<vmem>>, vector<2x32xf32>
    %5 = vector.shape_cast %3 : vector<1x32xf32> to vector<1x1x32xf32>
    %6 = vector.shape_cast %4 : vector<2x32xf32> to vector<1x2x32xf32>
    %7 = vector.broadcast %5 : vector<1x1x32xf32> to vector<1x2x32xf32>
    %8 = arith.mulf %7, %6 : vector<1x2x32xf32>
    %cst_5 = arith.constant dense<0.000000e+00> : vector<1x2xf32>
    %9 = vector.multi_reduction <add>, %8, %cst_5 [2] : vector<1x2x32xf32> to vector<1x2xf32>
    %c0_6 = arith.constant 0 : index
    %c0_7 = arith.constant 0 : index
    %10 = vector.load %arg3[%c0_6, %c0_7] : memref<1x2xf32, #tpu.memory_space<vmem>>, vector<1x2xf32>
    %11 = arith.addf %9, %10 : vector<1x2xf32>
    %cst_8 = arith.constant 0.000000e+00 : f32
    %12 = vector.broadcast %cst_8 : f32 to vector<1x2xf32>
    %13 = arith.maximumf %11, %12 : vector<1x2xf32>
    %c0_9 = arith.constant 0 : index
    %c0_10 = arith.constant 0 : index
    %14 = vector.load %arg4[%c0_9, %c0_10] : memref<32x2xf32, #tpu.memory_space<vmem>>, vector<32x2xf32>
    %15 = vector.shape_cast %13 : vector<1x2xf32> to vector<1x1x2xf32>
    %16 = vector.shape_cast %14 : vector<32x2xf32> to vector<1x32x2xf32>
    %17 = vector.broadcast %15 : vector<1x1x2xf32> to vector<1x32x2xf32>
    %18 = arith.mulf %17, %16 : vector<1x32x2xf32>
    %cst_11 = arith.constant dense<0.000000e+00> : vector<1x32xf32>
    %19 = vector.multi_reduction <add>, %18, %cst_11 [2] : vector<1x32x2xf32> to vector<1x32xf32>
    %c0_12 = arith.constant 0 : index
    %c0_13 = arith.constant 0 : index
    %20 = vector.load %arg5[%c0_12, %c0_13] : memref<1x32xf32, #tpu.memory_space<vmem>>, vector<1x32xf32>
    %21 = arith.addf %19, %20 : vector<1x32xf32>
    %22 = arith.negf %21 : vector<1x32xf32>
    %23 = math.exp %22 : vector<1x32xf32>
    %cst_14 = arith.constant 1.000000e+00 : f32
    %24 = vector.broadcast %cst_14 : f32 to vector<1x32xf32>
    %25 = arith.addf %24, %23 : vector<1x32xf32>
    %26 = arith.divf %24, %25 : vector<1x32xf32>
    %c0_15 = arith.constant 0 : index
    %c0_16 = arith.constant 0 : index
    %c0_17 = arith.constant 0 : index
    %27 = vector.load %arg1[%c0_15, %c0_16, %c0_17] : memref<1x32x256xf32, #tpu.memory_space<vmem>>, vector<1x32x256xf32>
    %28 = vector.shape_cast %26 : vector<1x32xf32> to vector<1x32x1xf32>
    %29 = vector.broadcast %28 : vector<1x32x1xf32> to vector<1x32x256xf32>
    %30 = arith.mulf %27, %29 : vector<1x32x256xf32>
    %c0_18 = arith.constant 0 : index
    %c0_19 = arith.constant 0 : index
    %c0_20 = arith.constant 0 : index
    %31 = vector.load %arg6[%c0_18, %c0_19, %c0_20] : memref<1x32x256xf32, #tpu.memory_space<vmem>>, vector<1x32x256xf32>
    tpu.vector_store %arg6[%c0_18, %c0_19, %c0_20], %30 {strides = array<i32>} : memref<1x32x256xf32, #tpu.memory_space<vmem>>, vector<1x32x256xf32>,
    return
  }
  func.func @transform_0(%arg0: i32) -> (i32, i32, i32) {
    %c0_i32 = arith.constant 0 : i32
    %c0_i32_0 = arith.constant 0 : i32
    %c0_i32_1 = arith.constant 0 : i32
    return %arg0, %c0_i32, %c0_i32_0 : i32, i32, i32
  }
  func.func @transform_1(%arg0: i32) -> (i32, i32) {
    %c0_i32 = arith.constant 0 : i32
    %c0_i32_0 = arith.constant 0 : i32
    %c0_i32_1 = arith.constant 0 : i32
    return %c0_i32, %c0_i32_0 : i32, i32
  }
  func.func @transform_2(%arg0: i32) -> (i32, i32) {
    %c0_i32 = arith.constant 0 : i32
    %c0_i32_0 = arith.constant 0 : i32
    %c0_i32_1 = arith.constant 0 : i32
    return %c0_i32, %c0_i32_0 : i32, i32
  }
  func.func @transform_3(%arg0: i32) -> (i32, i32) {
    %c0_i32 = arith.constant 0 : i32
    %c0_i32_0 = arith.constant 0 : i32
    %c0_i32_1 = arith.constant 0 : i32
    return %c0_i32, %c0_i32_0 : i32, i32
  }
  func.func @transform_4(%arg0: i32) -> (i32, i32) {
    %c0_i32 = arith.constant 0 : i32
    %c0_i32_0 = arith.constant 0 : i32
    %c0_i32_1 = arith.constant 0 : i32
    return %c0_i32, %c0_i32_0 : i32, i32
  }
  func.func @transform_5(%arg0: i32) -> (i32, i32, i32) {
    %c0_i32 = arith.constant 0 : i32
    %c0_i32_0 = arith.constant 0 : i32
    %c0_i32_1 = arith.constant 0 : i32
    return %arg0, %c0_i32, %c0_i32_0 : i32, i32, i32
  }
}

</mosaic_0001>

<bundles_post_ra>
// kernel: tpu_custom_call.1
= control target key start
LH: loop header
LB: loop body
LE: loop exit
PB: predicated region body
PF: predicated region fallthrough
CT: control target
= control target key end

     0   :  { %10 = vsyncpa [#allocation3], 0  ;;  %s1819_s0 = inlined_call_operand.hbm [shape: f32[2,32,256], index: 0, kind: input, shape index: {}]   ;;  %s1820_s1 = inlined_call_operand.vmem [shape: f32[2,32], index: 1, kind: input, shape index: {}]   ;;  %s1821_s2 = inlined_call_operand.vmem [shape: f32[1,2], index: 2, kind: input, shape index: {}]   ;;  %s1822_s3 = inlined_call_operand.vmem [shape: f32[32,2], index: 3, kind: input, shape index: {}]   ;;  %s1823_s4 = inlined_call_operand.vmem [shape: f32[1,32], index: 4, kind: input, shape index: {}]   ;;  %s1824_s5 = inlined_call_operand.hbm [shape: f32[2,32,256], index: 5, kind: output, shape index: {}]  }
   0x1   :  { %12 = vsyncpa [#allocation3 + $0x1], 0 }
   0x2   :  { %13 = vsyncpa [#allocation4], 0 }
   0x3   :  { %15 = vsyncpa [#allocation4 + $0x1], 0  ;;  %s1425_s18 = smov 0   ;;  %s1427_s19 = smov 0  }
   0x4   :  { %s1429_s20 = smov 0   ;;  %s1431_s21 = smov 0  }
   0x5 LB: > { %s1446_s22 = sadd.s32 4294967295, %s1386_s21   ;;  %s1199_s23 = sadd.s32 4294967294, %s1386_s21   ;;  %s1386_s21 = sphi %s1431_s21, %s1837_s21   ;;  %s1382_s20 = sphi %s1429_s20, %s1836_s20   ;;  %s1378_s19 = sphi %s1427_s19, %s1835_s19   ;;  %s1374_s18 = sphi %s1425_s18, %s1834_s18  }
   0x6   : > { %s1450_s24 = sadd.s32 1, %s1386_s21   ;;  %s28_s25 = sadd.s32 1, %s1382_s20 }
   0x7   : > { %s25_s26 = ssub.s32 %s1386_s21, %s1450_s24  ;;  %p35_p0 = scmp.ne.s32.totalorder %s1382_s20, %s1378_s19 }
   0x8   : > { %p26_p1 = scmp.eq.s32.totalorder %s25_s26, 0  ;;  %p36_p2 = scmp.eq.s32.totalorder %s1386_s21, 0 }
   0x9   : > { %p41_p3 = scmp.ne.s32.totalorder %s1378_s19, %s1374_s18  ;;  %p42_p4 = scmp.eq.s32.totalorder %s1446_s22, 0 }
   0xa   : > { %s1462_s27 = scalar_select %p26_p1, %s1382_s20, %s28_s25  }
   0xb   : > { %p1464_p5 = por %p36_p2, %p35_p0  ;;  %p1468_p6 = por %p42_p4, %p41_p3 }
   0xc   : > { %p149_p7 = scmp.eq.s32.totalorder %s1446_s22, 1  ;;  %p155_p8 = scmp.eq.s32.totalorder %s1199_s23, 1 }
   0xd   : > { %p1233_p10 = scmp.lt.s32.totalorder %s1386_s21, 2  ;;  %s187_s7 = sand.u32 1, %s1382_s20  }
   0xe   : > { %p1475_p11 = por %p149_p7, %p35_p0  ;;  %p1479_p12 = por %p155_p8, %p41_p3 }
   0xf   : > { %s1219_s8 = sshll.u32 %s1386_s21, 10  ;;  %s1202_s9 = sshll.u32 %s187_s7, 6 }
  0x10   : > { %s1828_s30 = scalar_select %p1475_p11, 1, 0 }
  0x11   : > { %s1829_s6 = scalar_select %p1479_p12, 1, 0 }
  0x12   : > { %s1488_s12 = scalar_lea.hbm %s1819_s0, %s1219_s8  ;;  %s191_s13 = scalar_lea.vmem [#allocation2], %s1202_s9 }
  0x13   : > { %s198_s14 = sshll.u32 %s191_s13, 4  ;;  %p1492_p13 = pnand %p1233_p10, %p1464_p5  ;;  %s1496_s14 = int_to_ptr.vmem [resolvable:$true] %s198_s14 }
  0x14   : > { %s1498_s16 = scalar_lea.sflag [#allocation3], %s187_s7  ;;  %s1290_s17 = scalar_lea.hbm %s1488_s12, 1024 }
  0x15   : > { %p1291_p0 = scmp.ne.s32.totalorder %s1488_s12, %s1290_s17  ;;  %p1292_p1 = pneg %p1492_p13 }
  0x16   : > { %s1295_s26 = scalar_lea.hbm %s1819_s0, 2048  ;;  %p1296_p4 = scmp.lt.u32.totalorder %s1488_s12, %s1819_s0 }
  0x17   : > { %p1293_p2 = pnand %p1292_p1, %p1291_p0  ;;  %p1297_p5 = scmp.lt.u32.totalorder %s1295_s26, %s1290_s17 }
  0x18   : > { %p1299_p8 = scmp.lt.u32.totalorder %s1290_s17, %s1488_s12 }
  0x19   : > { %p1294_p3 = pneg %p1293_p2  ;;  %p1298_p7 = por %p1297_p5, %p1296_p4 }
  0x1b   : > { %p1300_p10 = por %p1299_p8, %p1298_p7 }
  0x1d   : > { %p1301_p9 = pnand %p1300_p10, %p1294_p3 }
  0x1f   : > { %1304 = shalt.err (!%p1301_p9)
}
  0x20   : > { %s1305_s7 = scalar_lea.vmem %s1496_s14, 1024  ;;  %s1388_s9 = smov [#allocation2]  }
  0x21   : > { %p1306_p0 = scmp.ne.s32.totalorder %s1496_s14, %s1305_s7  ;;  %s1310_s10 = sshll.u32 %s1388_s9, 4  ;;  %s1311_s10 = int_to_ptr.vmem [resolvable:$false] %s1310_s10 }
  0x22   : > { %s1312_s11 = scalar_lea.vmem %s1311_s10, 2048  ;;  %p1313_p11 = scmp.lt.s32.totalorder %s1496_s14, %s1311_s10 }
  0x23   : > { %p1308_p2 = pnand %p1306_p0, %p1292_p1  ;;  %p1314_p4 = scmp.lt.s32.totalorder %s1312_s11, %s1305_s7 }
  0x25   : > { %p1309_p12 = pneg %p1308_p2  ;;  %p1315_p5 = por %p1314_p4, %p1313_p11 }
  0x27   : > { %p1316_p7 = pnand %p1315_p5, %p1309_p12 }
  0x29   : > { %1319 = shalt.err (!%p1316_p7)
}
  0x2a   : > { %s1389_s13 = smov 256   ;;  %s1390_s17 = smov 16  }
  0x2b   : > { %1228 = dma.hbm_to_vmem [thread:$0]  (!%p1492_p13), %s1488_s12, 1024, %s1496_s14, %s1498_s16, %s1389_s13, %s1389_s13, %s1390_s17  }
  0x2c   : > { %p1205_p9 = scmp.ge.s32.totalorder %s1386_s21, 1  ;;  %p206_p1 = scmp.lt.s32.totalorder %s1386_s21, 3 }
  0x2e   : > { %p207_p3 = pnand %p1205_p9, %p206_p1 }
  0x2f   : > { %s1529_s23 = sand.u32 (!%p207_p3), 1, %s1378_s19  }
  0x30   : > { %210 = sbr.rel (%p207_p3) target bundleno = 1020 (0x3fc), region = 40  ;;  %s1206_s25 = sshll.u32 (!%p207_p3), %s1529_s23, 6 }
  0x31   : > { %s213_s26 = scalar_lea.sflag (!%p207_p3), [#allocation3], %s1529_s23  ;;  %s216_s28 = scalar_lea.vmem (!%p207_p3), [#allocation2], %s1206_s25 }
  0x37   : > { %1365 = dma.done.wait (%p1468_p6), %s213_s26, 1024  }
  0x38   : > { %1367 = vsyncadd (%p1468_p6), %s213_s26, 4294966272  ;;  %v1539_v0 = vld [vmem:[%s216_s28 + $0x20] sm:$0xff]  ;;  %v1541_v1 = vld [vmem:[%s216_s28 + $0x28] sm:$0xff]  ;;  %v269_v12 = vlaneseq  ;;  %v1391_v19 = vmov 0   ;;  %vm366_vm0 = vcmask 130112   ;;  %vm373_vm1 = vcmask 195712  }
  0x39   : > { %v1543_v2 = vld [vmem:[%s216_s28] sm:$0xff]  ;;  %v257_v3 = vadd.f32 %v1541_v1, %v1539_v0  ;;  %v1547_v4 = vld [vmem:[%s216_s28 + $0x8] sm:$0xff]  ;;  %v1549_v5 = vld [vmem:[%s216_s28 + $0x30] sm:$0xff]  ;;  %1273 = vset.pattern.permute.xlu1 %v1391_v19  ;;  %1272 = vset.pattern.permute.xlu0 %v1391_v19  ;;  %vm380_vm2 = vcmask 261312   ;;  %vm401_vm3 = vcmask 1041409   ;;  %vm404_vm4 = vcmask 254976  }
  0x3a   : > { %v1551_v6 = vld [vmem:[%s216_s28 + $0x38] sm:$0xff]  ;;  %v251_v7 = vadd.f32 %v1547_v4, %v1543_v2  ;;  %v1555_v8 = vld [vmem:[%s216_s28 + $0x10] sm:$0xff]  ;;  %v1564_v13 = vshrl.u32 %v269_v12, 7  ;;  %v267_v15 = vld [vmem:[%s1820_s1] sm:$0x3]  ;;  %vm973_vm5 = vcmask 1042434  }
  0x3b   : > { %v1557_v9 = vld [vmem:[%s216_s28 + $0x18] sm:$0xff]  ;;  %258 = vadd.xlane.f32.xlu1 %v257_v3  ;;  %v260_v10 = vadd.f32 %v1551_v6, %v1549_v5  ;;  %v420_v41 = vld [vmem:[%s1822_s3] sm:$0xff]  ;;  %v422_v47 = vld [vmem:[%s1822_s3 + $0x10] sm:$0xff]  ;;  %vm975_vm6 = vcmask 1043459   ;;  %vm977_vm7 = vcmask 1044484   ;;  %vm979_vm8 = vcmask 1045509  }
  0x3c   : > { %252 = vadd.xlane.f32.xlu0 %v251_v7  ;;  %v254_v11 = vadd.f32 %v1557_v9, %v1555_v8  ;;  %v1567_v14 = vsub.s32 0, %v1564_v13  ;;  %v1574_v17 = vsub.s32 1, %v1564_v13  ;;  %v444_v39 = vsub.s32 2, %v1564_v13  ;;  %v1208_v51 = vld [vmem:[%s1821_s2] ss:$0 sm:$0xff]  ;;  %v421_v57 = vld [vmem:[%s1822_s3 + $0x8] sm:$0xff] }
  0x3d   : > { %v451_v45 = vsub.s32 3, %v1564_v13  ;;  %v458_v50 = vsub.s32 4, %v1564_v13  ;;  %v465_v55 = vsub.s32 5, %v1564_v13  ;;  %v472_v61 = vsub.s32 6, %v1564_v13  ;;  %s242_s29 = scalar_lea.vmem [#allocation5], %s1206_s25  ;;  %s1220_s14 = sshll.u32 %s1446_s22, 10 }
  0x3e   : > { %v272_v16 = vrot.slane %v267_v15, %v1567_v14  ;;  %v291_v18 = vrot.slane %v267_v15, %v1574_v17  ;;  %v445_v44 = vrot.slane %v420_v41, %v444_v39  ;;  %v431_v53 = vrot.slane %v420_v41, %v1567_v14  ;;  %v423_v15 = vld [vmem:[%s1822_s3 + $0x18] sm:$0xff]  ;;  %s1126_s12 = sshll.u32 %s242_s29, 4  ;;  %s1773_s16 = scalar_lea.hbm %s1824_s5, %s1220_s14  ;;  %s1766_s12 = int_to_ptr.vmem [resolvable:$true] %s1126_s12 }
  0x3f   : > { %261 = vadd.xlane.f32.xlu1 %v260_v10  ;;  %v564_v49 = vrot.slane %v422_v47, %v451_v45  ;;  %v459_v52 = vrot.slane %v420_v41, %v458_v50  ;;  %v571_v54 = vrot.slane %v422_v47, %v458_v50  ;;  %v438_v56 = vrot.slane %v420_v41, %v1574_v17  ;;  %s1113_s22 = scalar_lea.sflag [#allocation4], %s1529_s23  ;;  %s1320_s8 = scalar_lea.vmem %s1766_s12, 1024 }
  0x40   : > { %255 = vadd.xlane.f32.xlu0 %v254_v11  ;;  %v466_v58 = vrot.slane %v420_v41, %v465_v55  ;;  %v487_v59 = vrot.slane %v421_v57, %v1567_v14  ;;  %v578_v60 = vrot.slane %v422_v47, %v465_v55  ;;  %v494_v62 = vrot.slane %v421_v57, %v1574_v17  ;;  %p1321_p6 = scmp.ne.s32.totalorder %s1766_s12, %s1320_s8  ;;  %p1831_p11 = scmp.ne.s32.totalorder %s1828_s30, 0 }
  0x41   : > { %v473_v63 = vrot.slane %v420_v41, %v472_v61  ;;  %v543_v3 = vrot.slane %v422_v47, %v1567_v14  ;;  %v585_v7 = vrot.slane %v422_v47, %v472_v61  ;;  %v479_v10 = vsub.s32 7, %v1564_v13  ;;  %s1392_s7 = smov [#allocation5]  }
  0x42   : > { %v550_v11 = vrot.slane %v422_v47, %v1574_v17  ;;  %vm981_vm9 = vcmask 1046534   ;;  %vm983_vm10 = vcmask 1047559   ;;  %vm1010_vm11 = vcmask 15360   ;;  %p1322_p12 = pnand %p1321_p6, %p1831_p11  ;;  %s1324_s9 = sshll.u32 %s1392_s7, 4  ;;  %s1325_s9 = int_to_ptr.vmem [resolvable:$false] %s1324_s9 }
  0x43   : > { %v592_v19 = vrot.slane %v422_v47, %v479_v10  ;;  %s1326_s10 = scalar_lea.vmem %s1325_s9, 2048  ;;  %p1327_p8 = scmp.lt.s32.totalorder %s1766_s12, %s1325_s9 }
  0x44   : > { %p1323_p13 = pneg %p1322_p12  ;;  %p1328_p10 = scmp.lt.s32.totalorder %s1326_s10, %s1320_s8 }
  0x46   : > { %p1329_p0 = por %p1328_p10, %p1327_p8 }
  0x48   : > { %p1330_p2 = pnand %p1329_p0, %p1323_p13 }
  0x50   : > { %278 = vbcast.lane.b32.xlu1 %v272_v16, 264 }
  0x54   : > { %293 = vbcast.lane.b32.xlu1 %v291_v18, 256 }
  0x56   : > { %274 = vbcast.lane.b32.xlu0 %v272_v16, 256 }
  0x58   : > { %297 = vbcast.lane.b32.xlu1 %v291_v18, 264 }
  0x5a   : > { %282 = vbcast.lane.b32.xlu0 %v272_v16, 272 }
  0x5c   : > { %301 = vbcast.lane.b32.xlu1 %v291_v18, 272 }
  0x5e   : > { %286 = vbcast.lane.b32.xlu0 %v272_v16, 280  ;;  %v480_v16 = vrot.slane %v420_v41, %v479_v10 }
  0x60   : > { %305 = vbcast.lane.b32.xlu1 %v291_v18, 280  ;;  %v599_v18 = vrot.slane %v423_v15, %v1567_v14  ;;  %v515_v14 = vrot.slane %v421_v57, %v458_v50 }
  0xc8   : > { %v259_v20 = vpop.xlane.xlu1 %258 }
  0xc9   : > { %v253_v21 = vpop.xlane.xlu0 %252  ;;  %v265_v33 = vmul.f32 0.00390625, %v259_v20  ;;  %v606_v20 = vrot.slane %v423_v15, %v1574_v17  ;;  %v634_v17 = vrot.slane %v423_v15, %v465_v55 }
  0xca   : > { %v263_v25 = vmul.f32 0.00390625, %v253_v21  ;;  %v501_v21 = vrot.slane %v421_v57, %v444_v39 }
  0xcc   : > { %v262_v22 = vpop.xlane.xlu1 %261 }
  0xcd   : > { %v256_v23 = vpop.xlane.xlu0 %255  ;;  %v266_v38 = vmul.f32 0.00390625, %v262_v22  ;;  %v557_v22 = vrot.slane %v422_v47, %v444_v39 }
  0xce   : > { %v264_v24 = vmul.f32 0.00390625, %v256_v23  ;;  %v613_v23 = vrot.slane %v423_v15, %v444_v39 }
  0xd0   : > { %v279_v26 = vpop.permute.xlu1 %278 }
  0xd1   : > { %v316_v27 = vmul.f32 %v279_v26, %v264_v24  ;;  %v275_v28 = vpop.permute.xlu0 %274  ;;  %v620_v26 = vrot.slane %v423_v15, %v451_v45 }
  0xd2   : > { %v315_v29 = vmul.f32 %v275_v28, %v263_v25  ;;  %v522_v28 = vrot.slane %v421_v57, %v465_v55 }
  0xd3   : > { %335 = vperm.xlu1 %1273, %v316_v27   ;;  %v627_v27 = vrot.slane %v423_v15, %v458_v50 }
  0xd4   : > { %332 = vperm.xlu0 %1272, %v315_v29   ;;  %v294_v30 = vpop.permute.xlu1 %293  ;;  %v529_v29 = vrot.slane %v421_v57, %v472_v61 }
  0xd5   : > { %v319_v31 = vmul.f32 %v294_v30, %v263_v25  ;;  %v283_v32 = vpop.permute.xlu0 %282  ;;  %v508_v25 = vrot.slane %v421_v57, %v451_v45  ;;  %v641_v30 = vrot.slane %v423_v15, %v472_v61 }
  0xd6   : > { %v317_v35 = vmul.f32 %v283_v32, %v265_v33  ;;  %v648_v32 = vrot.slane %v423_v15, %v479_v10 }
  0xd7   : > { %344 = vperm.xlu1 %1273, %v319_v31   ;;  %v536_v31 = vrot.slane %v421_v57, %v479_v10 }
  0xd8   : > { %v298_v34 = vpop.permute.xlu1 %297 }
  0xd9   : > { %v320_v36 = vmul.f32 %v298_v34, %v264_v24  ;;  %v287_v37 = vpop.permute.xlu0 %286  ;;  %v452_v24 = vrot.slane %v420_v41, %v451_v45  ;;  %v356_v34 = vand.u32 127, %v269_v12 }
  0xda   : > { %v318_v42 = vmul.f32 %v287_v37, %v266_v38 }
  0xdb   : > { %347 = vperm.xlu0 %1272, %v320_v36   ;;  %338 = vperm.xlu1 %1273, %v317_v35   ;;  %v361_v37 = vadd.s32 4294967288, %v356_v34  ;;  %v375_v39 = vadd.s32 4294967272, %v356_v34 }
  0xdc   : > { %v302_v40 = vpop.permute.xlu1 %301 }
  0xdd   : > { %v321_v43 = vmul.f32 %v302_v40, %v265_v33  ;;  %v378_v45 = vsub.s32 %v375_v39, %v1564_v13 }
  0xdf   : > { %350 = vperm.xlu0 %1272, %v321_v43   ;;  %341 = vperm.xlu1 %1273, %v318_v42   ;;  %v1608_v42 = vsub.s32 %v356_v34, %v1564_v13  ;;  %v364_v43 = vsub.s32 %v361_v37, %v1564_v13 }
  0xe0   : > { %v306_v46 = vpop.permute.xlu1 %305 }
  0xe1   : > { %v322_v48 = vmul.f32 %v306_v46, %v266_v38  ;;  %v368_v38 = vadd.s32 4294967280, %v356_v34 }
  0xe3   : > { %353 = vperm.xlu0 %1272, %v322_v48   ;;  %447 = vbcast.lane.b32.xlu1 %v445_v44, 256  ;;  %v371_v44 = vsub.s32 %v368_v38, %v1564_v13 }
  0xe7   : > { %566 = vbcast.lane.b32.xlu1 %v564_v49, 256  ;;  %415 = vbcast.lane.b32.xlu0 %v1208_v51, 256 }
  0xeb   : > { %461 = vbcast.lane.b32.xlu1 %v459_v52, 256  ;;  %433 = vbcast.lane.b32.xlu0 %v431_v53, 256 }
  0xef   : > { %573 = vbcast.lane.b32.xlu1 %v571_v54, 256  ;;  %440 = vbcast.lane.b32.xlu0 %v438_v56, 256 }
  0xf3   : > { %468 = vbcast.lane.b32.xlu1 %v466_v58, 256  ;;  %489 = vbcast.lane.b32.xlu0 %v487_v59, 256 }
  0xf7   : > { %580 = vbcast.lane.b32.xlu1 %v578_v60, 256  ;;  %496 = vbcast.lane.b32.xlu0 %v494_v62, 256 }
  0xfb   : > { %475 = vbcast.lane.b32.xlu1 %v473_v63, 256  ;;  %545 = vbcast.lane.b32.xlu0 %v543_v3, 256 }
  0xff   : > { %587 = vbcast.lane.b32.xlu1 %v585_v7, 256  ;;  %552 = vbcast.lane.b32.xlu0 %v550_v11, 256 }
 0x103   : > { %482 = vbcast.lane.b32.xlu1 %v480_v16, 256  ;;  %601 = vbcast.lane.b32.xlu0 %v599_v18, 256 }
 0x107   : > { %594 = vbcast.lane.b32.xlu1 %v592_v19, 256  ;;  %608 = vbcast.lane.b32.xlu0 %v606_v20, 256 }
 0x10b   : > { %503 = vbcast.lane.b32.xlu0 %v501_v21, 256 }
 0x10f   : > { %559 = vbcast.lane.b32.xlu0 %v557_v22, 256 }
 0x113   : > { %615 = vbcast.lane.b32.xlu0 %v613_v23, 256 }
 0x117   : > { %454 = vbcast.lane.b32.xlu0 %v452_v24, 256 }
 0x11b   : > { %510 = vbcast.lane.b32.xlu0 %v508_v25, 256 }
 0x11f   : > { %622 = vbcast.lane.b32.xlu0 %v620_v26, 256 }
 0x123   : > { %517 = vbcast.lane.b32.xlu0 %v515_v14, 256 }
 0x127   : > { %629 = vbcast.lane.b32.xlu0 %v627_v27, 256 }
 0x12b   : > { %524 = vbcast.lane.b32.xlu0 %v522_v28, 256 }
 0x12f   : > { %636 = vbcast.lane.b32.xlu0 %v634_v17, 256 }
 0x133   : > { %531 = vbcast.lane.b32.xlu0 %v529_v29, 256 }
 0x137   : > { %643 = vbcast.lane.b32.xlu0 %v641_v30, 256 }
 0x13b   : > { %538 = vbcast.lane.b32.xlu0 %v536_v31, 256 }
 0x13f   : > { %650 = vbcast.lane.b32.xlu0 %v648_v32, 256 }
 0x152   : > { %v336_v33 = vpop.permute.xlu1 %335 }
 0x153   : > { %v333_v35 = vpop.permute.xlu0 %332  ;;  %v365_v48 = vrot.slane %v336_v33, %v364_v43 }
 0x154   : > { %v360_v12 = vrot.slane %v333_v35, %v1608_v42 }
 0x156   : > { %v345_v36 = vpop.permute.xlu1 %344  ;;  %v367_v55 = vsel %vm366_vm0, %v365_v48, %v360_v12 }
 0x157   : > { %v385_v52 = vrot.slane %v345_v36, %v1608_v42 }
 0x15a   : > { %v339_v40 = vpop.permute.xlu1 %338  ;;  %v348_v41 = vpop.permute.xlu0 %347 }
 0x15b   : > { %v389_v49 = vrot.slane %v348_v41, %v364_v43  ;;  %v372_v50 = vrot.slane %v339_v40, %v371_v44 }
 0x15d   : > { %v390_v56 = vsel %vm366_vm0, %v389_v49, %v385_v52  ;;  %v374_v13 = vsel %vm373_vm1, %v372_v50, %v367_v55 }
 0x15e   : > { %v342_v46 = vpop.permute.xlu1 %341  ;;  %v351_v47 = vpop.permute.xlu0 %350 }
 0x15f   : > { %v394_v51 = vrot.slane %v351_v47, %v371_v44  ;;  %v379_v53 = vrot.slane %v342_v46, %v378_v45 }
 0x161   : > { %v395_v58 = vsel %vm373_vm1, %v394_v51, %v390_v56  ;;  %v381_v59 = vsel %vm380_vm2, %v379_v53, %v374_v13 }
 0x162   : > { %v354_v54 = vpop.permute.xlu0 %353  ;;  %v448_v7 = vpop.permute.xlu1 %447 }
 0x163   : > { %v399_v57 = vrot.slane %v354_v54, %v378_v45 }
 0x165   : > { %v400_v60 = vsel %vm380_vm2, %v399_v57, %v395_v58 }
 0x166   : > { %v402_v61 = vsel %vm401_vm3, %v400_v60, %v381_v59  ;;  %v416_v63 = vpop.permute.xlu0 %415  ;;  %v567_v11 = vpop.permute.xlu1 %566 }
 0x167   : > { %v405_v62 = vsel %vm404_vm4, %v402_v61, 0.0 }
 0x168   : > { %406 = vadd.xlane.f32.xlu1 %v405_v62 }
 0x16a   : > { %v434_v3 = vpop.permute.xlu0 %433  ;;  %v462_v16 = vpop.permute.xlu1 %461 }
 0x16e   : > { %v441_v10 = vpop.permute.xlu0 %440  ;;  %v574_v19 = vpop.permute.xlu1 %573 }
 0x172   : > { %v490_v15 = vpop.permute.xlu0 %489  ;;  %v1616_v21 = vpop.permute.xlu1 %468 }
 0x176   : > { %v497_v18 = vpop.permute.xlu0 %496  ;;  %v1618_v23 = vpop.permute.xlu1 %580 }
 0x17a   : > { %v546_v20 = vpop.permute.xlu0 %545  ;;  %v1620_v25 = vpop.permute.xlu1 %475 }
 0x17e   : > { %v553_v22 = vpop.permute.xlu0 %552  ;;  %v1622_v14 = vpop.permute.xlu1 %587 }
 0x182   : > { %v602_v24 = vpop.permute.xlu0 %601  ;;  %v1624_v28 = vpop.permute.xlu1 %482 }
 0x186   : > { %v609_v26 = vpop.permute.xlu0 %608  ;;  %v1626_v29 = vpop.permute.xlu1 %594 }
 0x18a   : > { %v504_v27 = vpop.permute.xlu0 %503 }
 0x18e   : > { %v560_v17 = vpop.permute.xlu0 %559 }
 0x192   : > { %v616_v30 = vpop.permute.xlu0 %615 }
 0x196   : > { %v455_v33 = vpop.permute.xlu0 %454 }
 0x19a   : > { %v511_v37 = vpop.permute.xlu0 %510 }
 0x19e   : > { %v623_v43 = vpop.permute.xlu0 %622 }
 0x1a2   : > { %v518_v46 = vpop.permute.xlu0 %517 }
 0x1a6   : > { %v630_v50 = vpop.permute.xlu0 %629 }
 0x1aa   : > { %v525_v53 = vpop.permute.xlu0 %524 }
 0x1ae   : > { %v637_v13 = vpop.permute.xlu0 %636 }
 0x1b2   : > { %v532_v60 = vpop.permute.xlu0 %531 }
 0x1f5   : > { %v407_v31 = vpop.xlane.xlu1 %406 }
 0x1f6   : > { %v418_v32 = vadd.f32 %v416_v63, %v407_v31 }
 0x1f8   : > { %v1628_v34 = vmax.f32 %v418_v32, 0.0 }
 0x1fa   : > { %v684_v35 = vmul.f32 %v434_v3, %v1628_v34  ;;  %v685_v36 = vmul.f32 %v441_v10, %v1628_v34  ;;  %v692_v38 = vmul.f32 %v490_v15, %v1628_v34  ;;  %v693_v39 = vmul.f32 %v497_v18, %v1628_v34 }
 0x1fb   : > { %v700_v40 = vmul.f32 %v546_v20, %v1628_v34  ;;  %v701_v41 = vmul.f32 %v553_v22, %v1628_v34  ;;  %v708_v44 = vmul.f32 %v602_v24, %v1628_v34  ;;  %v709_v45 = vmul.f32 %v609_v26, %v1628_v34  ;;  %v1671_v24 = vld [vmem:[%s1823_s4] ss:$0 sm:$0xff] }
 0x1fc   : > { %749 = vperm.xlu1 %1273, %v684_v35   ;;  %752 = vperm.xlu0 %1272, %v685_v36   ;;  %v686_v47 = vmul.f32 %v448_v7, %v1628_v34  ;;  %v694_v48 = vmul.f32 %v504_v27, %v1628_v34  ;;  %v702_v12 = vmul.f32 %v560_v17, %v1628_v34  ;;  %v644_v7 = vpop.permute.xlu0 %643 }
 0x1fd   : > { %v710_v49 = vmul.f32 %v616_v30, %v1628_v34  ;;  %v687_v51 = vmul.f32 %v455_v33, %v1628_v34  ;;  %v695_v52 = vmul.f32 %v511_v37, %v1628_v34  ;;  %v703_v54 = vmul.f32 %v567_v11, %v1628_v34 }
 0x1fe   : > { %v711_v55 = vmul.f32 %v623_v43, %v1628_v34  ;;  %v688_v56 = vmul.f32 %v462_v16, %v1628_v34  ;;  %v696_v57 = vmul.f32 %v518_v46, %v1628_v34  ;;  %v704_v58 = vmul.f32 %v574_v19, %v1628_v34 }
 0x1ff   : > { %v712_v59 = vmul.f32 %v630_v50, %v1628_v34  ;;  %v689_v61 = vmul.f32 %v1616_v21, %v1628_v34  ;;  %v697_v62 = vmul.f32 %v525_v53, %v1628_v34  ;;  %v705_v63 = vmul.f32 %v1618_v23, %v1628_v34 }
 0x200   : > { %773 = vperm.xlu1 %1273, %v692_v38   ;;  %776 = vperm.xlu0 %1272, %v693_v39   ;;  %v713_v3 = vmul.f32 %v637_v13, %v1628_v34  ;;  %v690_v10 = vmul.f32 %v1620_v25, %v1628_v34  ;;  %v698_v11 = vmul.f32 %v532_v60, %v1628_v34  ;;  %v539_v16 = vpop.permute.xlu0 %538 }
 0x201   : > { %v706_v15 = vmul.f32 %v1622_v14, %v1628_v34  ;;  %v714_v18 = vmul.f32 %v644_v7, %v1628_v34  ;;  %v691_v19 = vmul.f32 %v1624_v28, %v1628_v34  ;;  %v699_v20 = vmul.f32 %v539_v16, %v1628_v34 }
 0x202   : > { %v707_v22 = vmul.f32 %v1626_v29, %v1628_v34 }
 0x204   : > { %797 = vperm.xlu1 %1273, %v700_v40   ;;  %800 = vperm.xlu0 %1272, %v701_v41   ;;  %v651_v21 = vpop.permute.xlu0 %650 }
 0x205   : > { %v715_v23 = vmul.f32 %v651_v21, %v1628_v34 }
 0x208   : > { %821 = vperm.xlu1 %1273, %v708_v44   ;;  %824 = vperm.xlu0 %1272, %v709_v45  }
 0x20c   : > { %755 = vperm.xlu1 %1273, %v686_v47   ;;  %779 = vperm.xlu0 %1272, %v694_v48  }
 0x210   : > { %803 = vperm.xlu1 %1273, %v702_v12   ;;  %827 = vperm.xlu0 %1272, %v710_v49  }
 0x214   : > { %758 = vperm.xlu1 %1273, %v687_v51   ;;  %782 = vperm.xlu0 %1272, %v695_v52  }
 0x218   : > { %806 = vperm.xlu1 %1273, %v703_v54   ;;  %830 = vperm.xlu0 %1272, %v711_v55  }
 0x21c   : > { %761 = vperm.xlu1 %1273, %v688_v56   ;;  %785 = vperm.xlu0 %1272, %v696_v57  }
 0x220   : > { %809 = vperm.xlu1 %1273, %v704_v58   ;;  %833 = vperm.xlu0 %1272, %v712_v59  }
 0x224   : > { %764 = vperm.xlu1 %1273, %v689_v61   ;;  %788 = vperm.xlu0 %1272, %v697_v62  }
 0x228   : > { %812 = vperm.xlu1 %1273, %v705_v63   ;;  %836 = vperm.xlu0 %1272, %v713_v3  }
 0x22c   : > { %767 = vperm.xlu1 %1273, %v690_v10   ;;  %791 = vperm.xlu0 %1272, %v698_v11  }
 0x230   : > { %815 = vperm.xlu1 %1273, %v706_v15   ;;  %839 = vperm.xlu0 %1272, %v714_v18  }
 0x234   : > { %770 = vperm.xlu1 %1273, %v691_v19   ;;  %794 = vperm.xlu0 %1272, %v699_v20  }
 0x238   : > { %818 = vperm.xlu1 %1273, %v707_v22   ;;  %842 = vperm.xlu0 %1272, %v715_v23  }
 0x23c   : > { %1034 = vbcast.lane.b32.xlu1 %v1671_v24, 264  ;;  %1030 = vbcast.lane.b32.xlu0 %v1671_v24, 256 }
 0x27b   : > { %v750_v25 = vpop.permute.xlu1 %749  ;;  %v753_v26 = vpop.permute.xlu0 %752 }
 0x27c   : > { %v847_v48 = vrot.slane %v750_v25, %v1608_v42  ;;  %v851_v12 = vrot.slane %v753_v26, %v1608_v42 }
 0x27e   : > { %v972_v61 = vsel %vm401_vm3, %v851_v12, %v847_v48 }
 0x27f   : > { %v774_v14 = vpop.permute.xlu1 %773  ;;  %v777_v27 = vpop.permute.xlu0 %776 }
 0x280   : > { %v879_v49 = vrot.slane %v774_v14, %v1608_v42  ;;  %v883_v50 = vrot.slane %v777_v27, %v1608_v42 }
 0x282   : > { %v985_v62 = vsel %vm401_vm3, %v883_v50, %v879_v49 }
 0x283   : > { %v798_v28 = vpop.permute.xlu1 %797  ;;  %v801_v17 = vpop.permute.xlu0 %800 }
 0x284   : > { %v911_v51 = vrot.slane %v798_v28, %v1608_v42  ;;  %v915_v52 = vrot.slane %v801_v17, %v1608_v42 }
 0x286   : > { %v992_v3 = vsel %vm401_vm3, %v915_v52, %v911_v51 }
 0x287   : > { %v822_v29 = vpop.permute.xlu1 %821  ;;  %v825_v30 = vpop.permute.xlu0 %824 }
 0x288   : > { %v943_v53 = vrot.slane %v822_v29, %v1608_v42  ;;  %v947_v54 = vrot.slane %v825_v30, %v1608_v42 }
 0x28a   : > { %v999_v7 = vsel %vm401_vm3, %v947_v54, %v943_v53 }
 0x28b   : > { %v756_v31 = vpop.permute.xlu1 %755  ;;  %v780_v32 = vpop.permute.xlu0 %779 }
 0x28c   : > { %v855_v56 = vrot.slane %v756_v31, %v1608_v42  ;;  %v887_v57 = vrot.slane %v780_v32, %v1608_v42 }
 0x28e   : > { %v974_v16 = vsel %vm973_vm5, %v855_v56, %v972_v61  ;;  %v986_v18 = vsel %vm973_vm5, %v887_v57, %v985_v62 }
 0x28f   : > { %v804_v33 = vpop.permute.xlu1 %803  ;;  %v828_v34 = vpop.permute.xlu0 %827 }
 0x290   : > { %v919_v58 = vrot.slane %v804_v33, %v1608_v42  ;;  %v951_v59 = vrot.slane %v828_v34, %v1608_v42 }
 0x292   : > { %v993_v22 = vsel %vm973_vm5, %v919_v58, %v992_v3  ;;  %v1000_v23 = vsel %vm973_vm5, %v951_v59, %v999_v7 }
 0x293   : > { %v759_v35 = vpop.permute.xlu1 %758  ;;  %v783_v36 = vpop.permute.xlu0 %782 }
 0x294   : > { %v859_v60 = vrot.slane %v759_v35, %v1608_v42  ;;  %v891_v63 = vrot.slane %v783_v36, %v1608_v42 }
 0x296   : > { %v976_v25 = vsel %vm975_vm6, %v859_v60, %v974_v16  ;;  %v987_v14 = vsel %vm975_vm6, %v891_v63, %v986_v18 }
 0x297   : > { %v1675_v37 = vpop.permute.xlu1 %806  ;;  %v1677_v38 = vpop.permute.xlu0 %830 }
 0x298   : > { %v923_v27 = vrot.slane %v1675_v37, %v1608_v42  ;;  %v955_v28 = vrot.slane %v1677_v38, %v1608_v42 }
 0x29a   : > { %v1001_v12 = vsel %vm975_vm6, %v955_v28, %v1000_v23 }
 0x29b   : > { %v762_v39 = vpop.permute.xlu1 %761  ;;  %v786_v40 = vpop.permute.xlu0 %785 }
 0x29c   : > { %v863_v10 = vrot.slane %v762_v39, %v1608_v42  ;;  %v895_v11 = vrot.slane %v786_v40, %v1608_v42 }
 0x29e   : > { %v978_v29 = vsel %vm977_vm7, %v863_v10, %v976_v25  ;;  %v988_v30 = vsel %vm977_vm7, %v895_v11, %v987_v14 }
 0x29f   : > { %v1679_v41 = vpop.permute.xlu1 %809  ;;  %v1681_v43 = vpop.permute.xlu0 %833 }
 0x2a0   : > { %v927_v31 = vrot.slane %v1679_v41, %v1608_v42  ;;  %v959_v32 = vrot.slane %v1681_v43, %v1608_v42 }
 0x2a2   : > { %v1002_v52 = vsel %vm977_vm7, %v959_v32, %v1001_v12 }
 0x2a3   : > { %v765_v44 = vpop.permute.xlu1 %764  ;;  %v789_v45 = vpop.permute.xlu0 %788 }
 0x2a4   : > { %v867_v19 = vrot.slane %v765_v44, %v1608_v42  ;;  %v899_v20 = vrot.slane %v789_v45, %v1608_v42  ;;  %v994_v44 = vsel %vm975_vm6, %v923_v27, %v993_v22 }
 0x2a5   : > { %v995_v49 = vsel %vm977_vm7, %v927_v31, %v994_v44 }
 0x2a6   : > { %v980_v34 = vsel %vm979_vm8, %v867_v19, %v978_v29  ;;  %v989_v35 = vsel %vm979_vm8, %v899_v20, %v988_v30 }
 0x2a7   : > { %v1683_v46 = vpop.permute.xlu1 %812  ;;  %v1685_v47 = vpop.permute.xlu0 %836 }
 0x2a8   : > { %v931_v36 = vrot.slane %v1683_v46, %v1608_v42  ;;  %v963_v39 = vrot.slane %v1685_v47, %v1608_v42 }
 0x2aa   : > { %v996_v53 = vsel %vm979_vm8, %v931_v36, %v995_v49  ;;  %v1003_v57 = vsel %vm979_vm8, %v963_v39, %v1002_v52 }
 0x2ab   : > { %v768_v55 = vpop.permute.xlu1 %767  ;;  %v792_v13 = vpop.permute.xlu0 %791 }
 0x2ac   : > { %v871_v26 = vrot.slane %v768_v55, %v1608_v42  ;;  %v903_v17 = vrot.slane %v792_v13, %v1608_v42 }
 0x2ae   : > { %v982_v43 = vsel %vm981_vm9, %v871_v26, %v980_v34  ;;  %v990_v46 = vsel %vm981_vm9, %v903_v17, %v989_v35 }
 0x2af   : > { %v816_v15 = vpop.permute.xlu1 %815  ;;  %v840_v21 = vpop.permute.xlu0 %839 }
 0x2b0   : > { %v935_v40 = vrot.slane %v816_v15, %v1608_v42  ;;  %v967_v45 = vrot.slane %v840_v21, %v1608_v42 }
 0x2b2   : > { %v997_v58 = vsel %vm981_vm9, %v935_v40, %v996_v53  ;;  %v1004_v60 = vsel %vm981_vm9, %v967_v45, %v1003_v57 }
 0x2b3   : > { %v771_v33 = vpop.permute.xlu1 %770  ;;  %v795_v38 = vpop.permute.xlu0 %794 }
 0x2b4   : > { %v875_v37 = vrot.slane %v771_v33, %v1608_v42  ;;  %v907_v41 = vrot.slane %v795_v38, %v1608_v42 }
 0x2b6   : > { %v984_v48 = vsel %vm983_vm10, %v875_v37, %v982_v43  ;;  %v991_v51 = vsel %vm983_vm10, %v907_v41, %v990_v46 }
 0x2b7   : > { %v819_v50 = vpop.permute.xlu1 %818  ;;  %v1011_v47 = vsel %vm1010_vm11, %v984_v48, 0.0  ;;  %v843_v55 = vpop.permute.xlu0 %842  ;;  %v1014_v56 = vsel %vm1010_vm11, %v991_v51, 0.0 }
 0x2b8   : > { %v939_v54 = vrot.slane %v819_v50, %v1608_v42  ;;  %1012 = vadd.xlane.f32.xlu1 %v1011_v47  ;;  %v971_v13 = vrot.slane %v843_v55, %v1608_v42  ;;  %1015 = vadd.xlane.f32.xlu0 %v1014_v56 }
 0x2ba   : > { %v998_v59 = vsel %vm983_vm10, %v939_v54, %v997_v58  ;;  %v1005_v62 = vsel %vm983_vm10, %v971_v13, %v1004_v60 }
 0x2bb   : > { %v1017_v61 = vsel %vm1010_vm11, %v998_v59, 0.0  ;;  %v1020_v63 = vsel %vm1010_vm11, %v1005_v62, 0.0  ;;  %v1035_v42 = vpop.permute.xlu1 %1034  ;;  %v1031_v3 = vpop.permute.xlu0 %1030 }
 0x2bc   : > { %1018 = vadd.xlane.f32.xlu0 %v1017_v61  ;;  %1021 = vadd.xlane.f32.xlu1 %v1020_v63 }
 0x2cd   : > { %1038 = vbcast.lane.b32.xlu1 %v1671_v24, 272 }
 0x2d2   : > { %1042 = vbcast.lane.b32.xlu0 %v1671_v24, 280 }
 0x345   : > { %v1013_v7 = vpop.xlane.xlu1 %1012  ;;  %v1016_v11 = vpop.xlane.xlu0 %1015 }
 0x346   : > { %v1048_v10 = vadd.f32 %v1031_v3, %v1013_v7  ;;  %v1049_v15 = vadd.f32 %v1035_v42, %v1016_v11 }
 0x348   : > { %v1210_v16 = vmul.f32 -1.442695, %v1048_v10  ;;  %v1211_v18 = vmul.f32 -1.442695, %v1049_v15 }
 0x349   : > { %v1022_v19 = vpop.xlane.xlu1 %1021  ;;  %v1019_v20 = vpop.xlane.xlu0 %1018 }
 0x34a   : > { %1274 = vpow2.f32 %v1210_v16 }
 0x34b   : > { %1276 = vpow2.f32 %v1211_v18 }
 0x34d   : > { %v1039_v21 = vpop.permute.xlu1 %1038  ;;  %v1043_v22 = vpop.permute.xlu0 %1042 }
 0x34e   : > { %v1050_v23 = vadd.f32 %v1039_v21, %v1019_v20  ;;  %v1051_v25 = vadd.f32 %v1043_v22, %v1022_v19 }
 0x350   : > { %v1212_v26 = vmul.f32 -1.442695, %v1050_v23  ;;  %v1213_v14 = vmul.f32 -1.442695, %v1051_v25 }
 0x352   : > { %1278 = vpow2.f32 %v1212_v26 }
 0x353   : > { %1280 = vpow2.f32 %v1213_v14 }
 0x354   : > { %v1275_v24 = vpop.eup %1274 }
 0x355   : > { %v1277_v27 = vpop.eup %1276  ;;  %v1064_v28 = vadd.f32 1.0, %v1275_v24 }
 0x356   : > { %v1065_v17 = vadd.f32 1.0, %v1277_v27 }
 0x357   : > { %1282 = vrcp.f32 %v1064_v28 }
 0x358   : > { %1284 = vrcp.f32 %v1065_v17 }
 0x35c   : > { %v1279_v29 = vpop.eup %1278 }
 0x35d   : > { %v1281_v30 = vpop.eup %1280  ;;  %v1066_v31 = vadd.f32 1.0, %v1279_v29 }
 0x35e   : > { %v1067_v32 = vadd.f32 1.0, %v1281_v30 }
 0x35f   : > { %1286 = vrcp.f32 %v1066_v31 }
 0x360   : > { %1288 = vrcp.f32 %v1067_v32 }
 0x361   : > { %v1283_v33 = vpop.eup %1282 }
 0x362   : > { %v1285_v34 = vpop.eup %1284  ;;  %1078 = vperm.xlu1 %1273, %v1283_v33  }
 0x363   : > { %1083 = vperm.xlu0 %1272, %v1285_v34  }
 0x369   : > { %v1287_v35 = vpop.eup %1286 }
 0x36a   : > { %v1289_v36 = vpop.eup %1288  ;;  %1088 = vperm.xlu1 %1273, %v1287_v35  }
 0x36b   : > { %1093 = vperm.xlu0 %1272, %v1289_v36  }
 0x3e1   : > { %v1079_v37 = vpop.permute.xlu1 %1078 }
 0x3e2   : > { %v1096_v38 = vmul.f32 %v1079_v37, %v1543_v2  ;;  %v1097_v39 = vmul.f32 %v1079_v37, %v1547_v4  ;;  %v1084_v40 = vpop.permute.xlu0 %1083 }
 0x3e3   : > { %v1098_v41 = vmul.f32 %v1084_v40, %v1555_v8  ;;  %v1099_v43 = vmul.f32 %v1084_v40, %v1557_v9 }
 0x3e4   : > { %1104 = vst [vmem:[%s242_s29] sm:$0xff] %v1096_v38  ;;  %1105 = vst [vmem:[%s242_s29 + $0x8] sm:$0xff] %v1097_v39 }
 0x3e5   : > { %1106 = vst [vmem:[%s242_s29 + $0x10] sm:$0xff] %v1098_v41  ;;  %1107 = vst [vmem:[%s242_s29 + $0x18] sm:$0xff] %v1099_v43 }
 0x3e9   : > { %v1089_v2 = vpop.permute.xlu1 %1088 }
 0x3ea   : > { %v1100_v4 = vmul.f32 %v1089_v2, %v1539_v0  ;;  %v1101_v8 = vmul.f32 %v1089_v2, %v1541_v1  ;;  %v1094_v9 = vpop.permute.xlu0 %1093 }
 0x3eb   : > { %v1102_v44 = vmul.f32 %v1094_v9, %v1549_v5  ;;  %v1103_v45 = vmul.f32 %v1094_v9, %v1551_v6 }
 0x3ec   : > { %1108 = vst [vmem:[%s242_s29 + $0x20] sm:$0xff] %v1100_v4  ;;  %1109 = vst [vmem:[%s242_s29 + $0x28] sm:$0xff] %v1101_v8 }
 0x3ed   : > { %1110 = vst [vmem:[%s242_s29 + $0x30] sm:$0xff] %v1102_v44  ;;  %1111 = vst [vmem:[%s242_s29 + $0x38] sm:$0xff] %v1103_v45 }
 0x3ee   : > { %1333 = shalt.err (!%p1330_p2)
}
 0x3ef   : > { %s1334_s11 = scalar_lea.hbm %s1773_s16, 1024  ;;  %s1338_s26 = scalar_lea.hbm %s1824_s5, 2048 }
 0x3f0   : > { %p1335_p4 = scmp.ne.s32.totalorder %s1773_s16, %s1334_s11  ;;  %p1339_p9 = scmp.lt.u32.totalorder %s1773_s16, %s1824_s5 }
 0x3f1   : > { %p1340_p1 = scmp.lt.u32.totalorder %s1338_s26, %s1334_s11  ;;  %p1342_p6 = scmp.lt.u32.totalorder %s1334_s11, %s1773_s16 }
 0x3f2   : > { %p1336_p5 = pnand %p1335_p4, %p1831_p11 }
 0x3f3   : > { %p1341_p3 = por %p1340_p1, %p1339_p9 }
 0x3f4   : > { %p1337_p7 = pneg %p1336_p5 }
 0x3f5   : > { %p1343_p12 = por %p1342_p6, %p1341_p3 }
 0x3f7   : > { %p1344_p13 = pnand %p1343_p12, %p1337_p7 }
 0x3f9   : > { %1347 = shalt.err (!%p1344_p13)
}
 0x3fa   : > { %s1393_s14 = smov 256   ;;  %s1394_s15 = smov 16  }
 0x3fb   : > { %1223 = dma.vmem_to_hbm [thread:$0]  (%p1831_p11), %s1766_s12, 1024, %s1773_s16, %s1113_s22, %s1393_s14, %s1393_s14, %s1394_s15  }
 0x3fc PF: > { %s1141_s25 = sand.u32 1, %s1374_s18   ;;  %p1832_p8 = scmp.ne.s32.totalorder %s1829_s6, 0 }
 0x3fd   : > { %p1833_p10 = scmp.ge.s32.totalorder %s1386_s21, 2  ;;  %s1142_s8 = scalar_lea.sflag [#allocation4], %s1141_s25 }
 0x3ff   : > { %p1230_p0 = pnand %p1833_p10, %p1832_p8 }
 0x401   : > { %1369 = dma.done.wait (!%p1230_p0), %s1142_s8, 1024  }
 0x402   : > { %1371 = vsyncadd (!%p1230_p0), %s1142_s8, 4294966272  ;;  %p18_p2 = scmp.ge.s32.totalorder %s1450_s24, 4   ;;  %s1834_s18 = smov %s1378_s19 }
 0x403   : > { %s1835_s19 = smov %s1382_s20  ;;  %s1836_s20 = smov %s1462_s27 }
 0x404   : > { %s1837_s21 = smov %s1450_s24  ;;  %20 = sbr.rel (!%p18_p2) target bundleno = 5 (0x5), region = 85 }
 0x40b   :  { %1147 = vsyncpa [#allocation3], 1 }
 0x40c   :  { %1149 = vsyncpa [#allocation3 + $0x1], 1 }
 0x40d   :  { %1150 = vsyncpa [#allocation4], 1 }
 0x40e   :  { %1152 = vsyncpa [#allocation4 + $0x1], 1 }

</bundles_post_ra>
